<compile_context>
chip_gen: v6e
topology: v6e:2x2x1
jax: 0.10.0
libtpu: 0.0.40
codegen_flags: <defaults>
</compile_context>

<pallas_src>
import jax
import jax.numpy as jnp
from jax.experimental import pallas as pl
from jax.experimental.pallas import tpu as pltpu

N_TOKEN = 128
N_BITS = 4


def _round_up(a: int, b: int) -> int:
    return -(-a // b) * b


def _embedding_kernel(idx_ref, tblT_ref, out_ref):
    # idx_ref:  (1, TB)  int32  token ids (lane dense)
    # tblT_ref: (8, 128) f32    rows 0..3 = w_0 bits, rows 4..7 = w_1 bits
    # out_ref:  (8, TB)  f32    out[r, g] = tblT[r, idx[g]]
    sub = jax.lax.broadcasted_iota(jnp.int32, (N_TOKEN, 1), 0)       # (128, 1)
    onehot = (sub == idx_ref[...]).astype(jnp.float32)               # (128, TB)
    # Exact row selection on the MXU.  HIGHEST pins the multi-pass f32 path so
    # the gathered table values are reproduced to full f32 accuracy.
    out_ref[...] = jnp.dot(tblT_ref[...], onehot,
                           precision=jax.lax.Precision.HIGHEST,
                           preferred_element_type=jnp.float32)


def _choose_tiling(n: int, tile: int):
    n128 = _round_up(max(n, 1), 128)
    if n128 >= 2 * tile:
        tb = tile                                   # big tiles, grid >= 2 anyway
    elif n128 >= 2 * 128:
        # Split the work into (at least) two grid steps so both v7x
        # TensorCores get a tile on the "parallel" axis.
        tb = _round_up(-(-n128 // 2), 128)
    else:
        tb = n128                                   # tiny input: single step
    return tb, _round_up(n128, tb)


def embedding_layer_forward(x, w, *, tile: int = 4096):
    """x: integer token ids (any shape, values in [0, 128));
    w: (2, 128, 4) float32.  Returns (x_0, x_1), each of shape x.shape + (4,)."""
    assert w.shape == (2, N_TOKEN, N_BITS)
    tile = max(128, _round_up(tile, 128))

    orig_shape = x.shape
    idx = jnp.asarray(x, jnp.int32).reshape(-1)
    n = idx.shape[0]

    # Hoisted weight prep (once, in XLA): stable pairwise log-softmax, packed
    # transposed / lane-dense as (8, 128) so it stays resident in VMEM.
    lse = jnp.logaddexp(w[0], w[1])                                   # (128, 4)
    table_t = jnp.concatenate([w[0] - lse, w[1] - lse], axis=-1).T    # (8, 128)
    table_t = table_t.astype(jnp.float32)

    tb, n_pad = _choose_tiling(n, tile)
    idx_pad = jnp.pad(idx, (0, n_pad - n)).reshape(1, n_pad)

    out = pl.pallas_call(
        _embedding_kernel,
        out_shape=jax.ShapeDtypeStruct((2 * N_BITS, n_pad), jnp.float32),
        grid=(n_pad // tb,),
        in_specs=[
            pl.BlockSpec((1, tb), lambda i: (0, i)),                  # token ids
            pl.BlockSpec((2 * N_BITS, N_TOKEN), lambda i: (0, 0)),    # resident table
        ],
        out_specs=pl.BlockSpec((2 * N_BITS, tb), lambda i: (0, i)),
        compiler_params=pltpu.CompilerParams(
            dimension_semantics=("parallel",),
            vmem_limit_bytes=32 << 20),
    )(idx_pad, table_t)

    x_0 = out[:N_BITS, :n].T.reshape(orig_shape + (N_BITS,))
    x_1 = out[N_BITS:, :n].T.reshape(orig_shape + (N_BITS,))
    return x_0, x_1


def _reference_forward(x, w):
    # Pure-JAX reference mirroring the PyTorch forward exactly.
    lse = jnp.logaddexp(w[0], w[1])
    return (w[0] - lse)[x], (w[1] - lse)[x]


if __name__ == "__main__":
    key = jax.random.PRNGKey(0)
    kx, kw = jax.random.split(key)

    # Small shapes consistent with the module: batch=2, seq=8 token ids.
    B, S = 2, 8
    x = jax.random.randint(kx, (B, S), 0, N_TOKEN, dtype=jnp.int32)
    # Deterministic stand-in for torch.randn((2, 128, 4)) in build().
    # TODO(synk): params_pairs_norm is a training-time, out-of-band weight
    # renormalisation (not applied in forward()), so it is intentionally omitted.
    w = jax.random.normal(kw, (2, N_TOKEN, N_BITS), dtype=jnp.float32)

    y0, y1 = embedding_layer_forward(x, w)
    jax.block_until_ready((y0, y1))

    r0, r1 = _reference_forward(x, w)
    assert y0.shape == (B, S, N_BITS) and y1.shape == (B, S, N_BITS)
    assert jnp.allclose(y0, r0, atol=1e-5, rtol=1e-5)
    assert jnp.allclose(y1, r1, atol=1e-5, rtol=1e-5)

    # Also exercise padding and a multi-step ("parallel") grid.
    x2 = jax.random.randint(kx, (3, 100), 0, N_TOKEN, dtype=jnp.int32)
    z0, z1 = embedding_layer_forward(x2, w)
    jax.block_until_ready((z0, z1))
    s0, s1 = _reference_forward(x2, w)
    assert jnp.allclose(z0, s0, atol=1e-5, rtol=1e-5)
    assert jnp.allclose(z1, s1, atol=1e-5, rtol=1e-5)

    print("KERNEL_OK")
</pallas_src>

<mosaic_0001>
module attributes {stable_mosaic.version = 11 : i64} {
  func.func @_embedding_kernel(%arg0: i32, %arg1: memref<1x128xi32, #tpu.memory_space<vmem>>, %arg2: memref<8x128xf32, #tpu.memory_space<vmem>>, %arg3: memref<8x128xf32, #tpu.memory_space<vmem>>) attributes {dimension_semantics = [#tpu.dimension_semantics<parallel>], iteration_bounds = array<i64: 1>, scalar_prefetch = 0 : i64, scratch_operands = 0 : i64, tpu.core_type = #tpu.core_type<tc>, window_params = [{transform_indices = @transform_0, window_bounds = array<i64: 1, 128>}, {pipeline_mode = #tpu.pipeline_mode<synchronous>, transform_indices = @transform_1, window_bounds = array<i64: 8, 128>}, {transform_indices = @transform_2, window_bounds = array<i64: 8, 128>}]} {
    %0 = tpu.iota {dimensions = array<i32: 0>} : vector<128x1xi32>
    %c0 = arith.constant 0 : index
    %c0_0 = arith.constant 0 : index
    %1 = vector.load %arg1[%c0, %c0_0] : memref<1x128xi32, #tpu.memory_space<vmem>>, vector<1x128xi32>
    %2 = vector.broadcast %0 : vector<128x1xi32> to vector<128x128xi32>
    %3 = vector.broadcast %1 : vector<1x128xi32> to vector<128x128xi32>
    %4 = arith.cmpi eq, %2, %3 : vector<128x128xi32>
    %5 = arith.extui %4 : vector<128x128xi1> to vector<128x128xi32>
    %6 = arith.sitofp %5 : vector<128x128xi32> to vector<128x128xf32>
    %c0_1 = arith.constant 0 : index
    %c0_2 = arith.constant 0 : index
    %7 = vector.load %arg2[%c0_1, %c0_2] : memref<8x128xf32, #tpu.memory_space<vmem>>, vector<8x128xf32>
    %cst = arith.constant dense<0.000000e+00> : vector<8x128xf32>
    %8 = tpu.matmul %7, %6, %cst {dimension_numbers = #tpu.dot_dimension_numbers<[1], [0], [0], [1], [0, 0, 1, 1], [], []>, precision = #tpu.contract_precision<fp32>} : vector<8x128xf32>, vector<128x128xf32>, vector<8x128xf32> -> vector<8x128xf32>
    %c0_3 = arith.constant 0 : index
    %c0_4 = arith.constant 0 : index
    %9 = vector.load %arg3[%c0_3, %c0_4] : memref<8x128xf32, #tpu.memory_space<vmem>>, vector<8x128xf32>
    tpu.vector_store %arg3[%c0_3, %c0_4], %8 {strides = array<i32>} : memref<8x128xf32, #tpu.memory_space<vmem>>, vector<8x128xf32>,
    return
  }
  func.func @transform_0(%arg0: i32) -> (i32, i32) {
    %c0_i32 = arith.constant 0 : i32
    %c0_i32_0 = arith.constant 0 : i32
    return %c0_i32, %arg0 : i32, i32
  }
  func.func @transform_1(%arg0: i32) -> (i32, i32) {
    %c0_i32 = arith.constant 0 : i32
    %c0_i32_0 = arith.constant 0 : i32
    %c0_i32_1 = arith.constant 0 : i32
    return %c0_i32, %c0_i32_0 : i32, i32
  }
  func.func @transform_2(%arg0: i32) -> (i32, i32) {
    %c0_i32 = arith.constant 0 : i32
    %c0_i32_0 = arith.constant 0 : i32
    return %c0_i32, %arg0 : i32, i32
  }
}

</mosaic_0001>

<bundles_post_ra>
// kernel: tpu_custom_call.1
= control target key start
LH: loop header
LB: loop body
LE: loop exit
PB: predicated region body
PF: predicated region fallthrough
CT: control target
= control target key end

     0   :  { %7 = vsyncpa [#allocation3], 0  ;;  %s1848_s0 = inlined_call_operand.hbm [shape: s32[1,128], index: 0, kind: input, shape index: {}]   ;;  %s1849_s1 = inlined_call_operand.hbm [shape: f32[8,128], index: 1, kind: input, shape index: {}]   ;;  %s1850_s2 = inlined_call_operand.hbm [shape: f32[8,128], index: 2, kind: output, shape index: {}]  }
   0x1   :  { %8 = vsyncpa [#allocation6], 0 }
   0x2   :  { %9 = vsyncpa [#allocation4], 0  ;;  %s1214_s9 = smov [#allocation2]   ;;  %s1215_s11 = smov [#allocation5]  }
   0x3   :  { %s16_s10 = sshll.u32 %s1214_s9, 4  ;;  %s26_s12 = sshll.u32 %s1215_s11, 4  ;;  %s17_s10 = int_to_ptr.vmem [resolvable:$true] %s16_s10  ;;  %s27_s12 = int_to_ptr.vmem [resolvable:$true] %s26_s12 }
   0x4   :  { %s1156_s13 = scalar_lea.vmem %s17_s10, 16  ;;  %s1160_s14 = scalar_lea.vmem %s17_s10, 32 }
   0x5   :  { %p1157_p0 = scmp.ne.s32.totalorder %s17_s10, %s1156_s13  ;;  %p1161_p1 = scmp.lt.s32.totalorder %s17_s10, %s17_s10 }
   0x6   :  { %p1162_p2 = scmp.lt.s32.totalorder %s1160_s14, %s1156_s13 }
   0x8   :  { %p1163_p3 = por %p1162_p2, %p1161_p1 }
   0xa   :  { %p1164_p4 = pnand %p1163_p3, %p1157_p0 }
   0xc   :  { %1167 = shalt.err (!%p1164_p4)
}
   0xd   :  { %19 = dma.hbm_to_vmem [thread:$0]  %s1848_s0, 16, %s17_s10, [#allocation3]  }
   0xe   :  { %s1176_s17 = scalar_lea.vmem %s27_s12, 128  ;;  %p1181_p6 = scmp.lt.s32.totalorder %s27_s12, %s27_s12 }
   0xf   :  { %p1177_p5 = scmp.ne.s32.totalorder %s27_s12, %s1176_s17  ;;  %p1182_p7 = scmp.lt.s32.totalorder %s1176_s17, %s1176_s17 }
  0x11   :  { %p1183_p8 = por %p1182_p7, %p1181_p6 }
  0x13   :  { %p1184_p9 = pnand %p1183_p8, %p1177_p5 }
  0x15   :  { %1187 = shalt.err (!%p1184_p9)
}
  0x16   :  { %29 = dma.hbm_to_vmem [thread:$0]  %s1849_s1, 128, %s27_s12, [#allocation6]  }
  0x17   :  { %1208 = dma.done.wait [#allocation3], 16  }
  0x18   :  { %1209 = vsyncadd [#allocation3], 4294967280 }
  0x19   :  { %1210 = dma.done.wait [#allocation6], 128  }
  0x1a   :  { %1211 = vsyncadd [#allocation6], 4294967168  ;;  %v36_v0 = vlaneseq  ;;  %v1216_v1 = vmov 0.0   ;;  %vm1851_vm0 = vmmov 0   ;;  %v1264_v8 = vld [vmem:[#allocation2] ss:$0 sm:$0xff] }
  0x1b   :  { %932 = vmatprep.subr.mxu0 %v1216_v1  ;;  %967 = vmatprep.subr.mxu1 %v1216_v1  ;;  %v1218_v13 = vmov 1.0   ;;  %s1219_s0 = smov [#allocation7]  }
  0x1c   :  { %v1243_v2 = vshrl.u32 %v36_v0, 7  ;;  %964 = vmatprep.mubr.msk.f32.mxu0 %vm1851_vm0, %v1216_v1  ;;  %999 = vmatprep.mubr.msk.f32.mxu1 %vm1851_vm0, %v1216_v1  ;;  %v106_v0 = vld [vmem:[#allocation5] sm:$0xff]  ;;  %s755_s1 = sshll.u32 %s1219_s0, 4  ;;  %s756_s1 = int_to_ptr.vmem [resolvable:$true] %s755_s1 }
  0x1d   :  { %s1188_s20 = scalar_lea.vmem %s756_s1, 128  ;;  %p1193_p11 = scmp.lt.s32.totalorder %s756_s1, %s756_s1 }
  0x1e   :  { %v1250_v3 = vadd.s32 120, %v1243_v2  ;;  %v1253_v4 = vadd.s32 112, %v1243_v2  ;;  %v1256_v5 = vadd.s32 104, %v1243_v2  ;;  %v1259_v6 = vadd.s32 96, %v1243_v2  ;;  %p1189_p10 = scmp.ne.s32.totalorder %s756_s1, %s1188_s20  ;;  %p1194_p12 = scmp.lt.s32.totalorder %s1188_s20, %s1188_s20 }
  0x1f   :  { %v1262_v7 = vadd.s32 88, %v1243_v2  ;;  %v1267_v9 = vadd.s32 80, %v1243_v2  ;;  %v1270_v10 = vadd.s32 72, %v1243_v2  ;;  %v1273_v11 = vadd.s32 64, %v1243_v2 }
  0x20   :  { %v1276_v12 = vadd.s32 56, %v1243_v2  ;;  %vm73_vm1 = vcmp.eq.s32.totalorder %v1250_v3, %v1264_v8  ;;  %vm72_vm2 = vcmp.eq.s32.totalorder %v1253_v4, %v1264_v8  ;;  %vm71_vm3 = vcmp.eq.s32.totalorder %v1256_v5, %v1264_v8  ;;  %p1195_p13 = por %p1194_p12, %p1193_p11 }
  0x21   :  { %vm70_vm4 = vcmp.eq.s32.totalorder %v1259_v6, %v1264_v8  ;;  %933 = vmatpush3.msk.msra.mxu0 %vm73_vm1, %v1218_v13  ;;  %v780_v14 = vsel %vm72_vm2, 1.0, %v1216_v1  ;;  %v779_v15 = vsel %vm71_vm3, 1.0, %v1216_v1  ;;  %vm69_vm5 = vcmp.eq.s32.totalorder %v1262_v7, %v1264_v8 }
  0x22   :  { %v778_v16 = vsel %vm70_vm4, 1.0, %v1216_v1  ;;  %934 = vmatprep.subr.mxu0 %v1216_v1  ;;  %v1305_v17 = vsub.f32 %v780_v14, %v780_v14  ;;  %v1307_v18 = vsub.f32 %v779_v15, %v779_v15  ;;  %v777_v20 = vsel %vm69_vm5, 1.0, %v1216_v1  ;;  %p1196_p0 = pnand %p1195_p13, %p1189_p10 }
  0x23   :  { %v1309_v19 = vsub.f32 %v778_v16, %v778_v16  ;;  %935 = vmatpush3.msk.msra.mxu0 %vm72_vm2, %v1218_v13  ;;  %v1319_v21 = vsub.f32 %v777_v20, %v777_v20  ;;  %v781_v22 = vsel %vm73_vm1, 1.0, %v1216_v1  ;;  %vm68_vm6 = vcmp.eq.s32.totalorder %v1267_v9, %v1264_v8 }
  0x24   :  { %vm67_vm7 = vcmp.eq.s32.totalorder %v1270_v10, %v1264_v8  ;;  %936 = vmatprep.subr.mxu0 %v1216_v1  ;;  %v1330_v23 = vsub.f32 %v781_v22, %v781_v22  ;;  %v776_v24 = vsel %vm68_vm6, 1.0, %v1216_v1  ;;  %v208_v25 = vand.u32 4294901760, %v1305_v17 }
  0x25   :  { %v775_v26 = vsel %vm67_vm7, 1.0, %v1216_v1  ;;  %937 = vmatpush3.msk.msra.mxu0 %vm71_vm3, %v1218_v13  ;;  %v1345_v27 = vsub.f32 %v776_v24, %v776_v24  ;;  %v215_v28 = vand.u32 4294901760, %v1307_v18  ;;  %vm66_vm8 = vcmp.eq.s32.totalorder %v1273_v11, %v1264_v8 }
  0x26   :  { %v1351_v29 = vadd.s32 48, %v1243_v2  ;;  %938 = vmatprep.subr.mxu0 %v1216_v1  ;;  %v201_v30 = vand.u32 4294901760, %v1330_v23  ;;  %v209_v31 = vsub.f32 %v1305_v17, %v208_v25  ;;  %v774_v32 = vsel %vm66_vm8, 1.0, %v1216_v1 }
  0x27   :  { %v222_v33 = vand.u32 4294901760, %v1309_v19  ;;  %939 = vmatpush3.msk.msra.mxu0 %vm70_vm4, %v1218_v13  ;;  %v1367_v34 = vsub.f32 %v775_v26, %v775_v26  ;;  %vm1853_vm9 = vcmp.eq.s32.totalorder %v1276_v12, %v1264_v8  ;;  %v1372_v35 = vadd.s32 40, %v1243_v2 }
  0x28   :  { %940 = vmatprep.subr.mxu0 %v1216_v1  ;;  %v202_v36 = vsub.f32 %v1330_v23, %v201_v30  ;;  %v216_v37 = vsub.f32 %v1307_v18, %v215_v28  ;;  %v229_v38 = vand.u32 4294901760, %v1319_v21  ;;  %v1383_v39 = vadd.s32 32, %v1243_v2 }
  0x29   :  { %941 = vmatpush3.msk.msra.mxu0 %vm69_vm5, %v1218_v13  ;;  %v1389_v40 = vsub.f32 %v774_v32, %v774_v32  ;;  %v773_v41 = vsel %vm1853_vm9, 1.0, %v1216_v1  ;;  %vm64_vm10 = vcmp.eq.s32.totalorder %v1351_v29, %v1264_v8  ;;  %v1398_v42 = vadd.s32 24, %v1243_v2 }
  0x2a   :  { %942 = vmatprep.subr.mxu0 %v1216_v1  ;;  %v203_v43 = vand.u32 4294901760, %v202_v36  ;;  %v210_v44 = vand.u32 4294901760, %v209_v31  ;;  %v223_v45 = vsub.f32 %v1309_v19, %v222_v33  ;;  %v236_v46 = vand.u32 4294901760, %v1345_v27 }
  0x2b   :  { %943 = vmatpush3.msk.msra.mxu0 %vm68_vm6, %v1218_v13  ;;  %v772_v47 = vsel %vm64_vm10, 1.0, %v1216_v1  ;;  %vm63_vm11 = vcmp.eq.s32.totalorder %v1372_v35, %v1264_v8  ;;  %v243_v48 = vand.u32 4294901760, %v1367_v34  ;;  %v1417_v49 = vadd.s32 16, %v1243_v2 }
  0x2c   :  { %968 = vmatpush3.msra.mxu1 %v203_v43  ;;  %944 = vmatprep.subr.mxu0 %v1216_v1  ;;  %v217_v50 = vand.u32 4294901760, %v216_v37  ;;  %v1420_v51 = vsub.f32 %v773_v41, %v773_v41  ;;  %v230_v52 = vsub.f32 %v1319_v21, %v229_v38  ;;  %vm62_vm12 = vcmp.eq.s32.totalorder %v1383_v39, %v1264_v8 }
  0x2d   :  { %969 = vmatprep.subr.mxu1 %v1216_v1  ;;  %945 = vmatpush3.msk.msra.mxu0 %vm67_vm7, %v1218_v13  ;;  %v237_v53 = vsub.f32 %v1345_v27, %v236_v46  ;;  %v771_v54 = vsel %vm63_vm11, 1.0, %v1216_v1  ;;  %v1440_v55 = vadd.s32 8, %v1243_v2  ;;  %v224_v56 = vand.u32 4294901760, %v223_v45 }
  0x2e   :  { %970 = vmatpush3.msra.mxu1 %v210_v44  ;;  %946 = vmatprep.subr.mxu0 %v1216_v1  ;;  %v1443_v57 = vsub.f32 %v772_v47, %v772_v47  ;;  %v250_v58 = vand.u32 4294901760, %v1389_v40  ;;  %vm61_vm13 = vcmp.eq.s32.totalorder %v1398_v42, %v1264_v8  ;;  %v244_v59 = vsub.f32 %v1367_v34, %v243_v48 }
  0x2f   :  { %971 = vmatprep.subr.mxu1 %v1216_v1  ;;  %947 = vmatpush3.msk.msra.mxu0 %vm66_vm8, %v1218_v13  ;;  %v770_v60 = vsel %vm62_vm12, 1.0, %v1216_v1  ;;  %v231_v61 = vand.u32 4294901760, %v230_v52  ;;  %v1461_v62 = vsub.f32 %v771_v54, %v771_v54  ;;  %v257_v63 = vand.u32 4294901760, %v1420_v51 }
  0x30   :  { %972 = vmatpush3.msra.mxu1 %v217_v50  ;;  %948 = vmatprep.subr.mxu0 %v1216_v1  ;;  %vm60_vm14 = vcmp.eq.s32.totalorder %v1417_v49, %v1264_v8  ;;  %v238_v14 = vand.u32 4294901760, %v237_v53  ;;  %v769_v15 = vsel %vm61_vm13, 1.0, %v1216_v1  ;;  %v1476_v16 = vsub.f32 %v770_v60, %v770_v60 }
  0x31   :  { %973 = vmatprep.subr.mxu1 %v1216_v1  ;;  %949 = vmatpush3.msk.msra.mxu0 %vm1853_vm9, %v1218_v13  ;;  %v251_v20 = vsub.f32 %v1389_v40, %v250_v58  ;;  %v264_v22 = vand.u32 4294901760, %v1443_v57  ;;  %vm59_vm15 = vcmp.eq.s32.totalorder %v1440_v55, %v1264_v8  ;;  %v245_v24 = vand.u32 4294901760, %v244_v59 }
  0x32   :  { %974 = vmatpush3.msra.mxu1 %v224_v56  ;;  %950 = vmatprep.subr.mxu0 %v1216_v1  ;;  %v768_v26 = vsel %vm60_vm14, 1.0, %v1216_v1  ;;  %v1493_v31 = vand.u32 4294901760, %v106_v0  ;;  %v1496_v32 = vsub.f32 %v769_v15, %v769_v15  ;;  %v258_v36 = vsub.f32 %v1420_v51, %v257_v63 }
  0x33   :  { %975 = vmatprep.subr.mxu1 %v1216_v1  ;;  %951 = vmatpush3.msk.msra.mxu0 %vm64_vm10, %v1218_v13  ;;  %v271_v37 = vand.u32 4294901760, %v1461_v62  ;;  %vm58_vm0 = vcmp.eq.s32.totalorder %v1243_v2, %v1264_v8  ;;  %v767_v41 = vsel %vm59_vm15, 1.0, %v1216_v1  ;;  %v252_v44 = vand.u32 4294901760, %v251_v20 }
  0x34   :  { %976 = vmatpush3.msra.mxu1 %v231_v61  ;;  %952 = vmatprep.subr.mxu0 %v1216_v1  ;;  %v1514_v43 = vsub.f32 %v106_v0, %v1493_v31  ;;  %v1517_v45 = vsub.f32 %v768_v26, %v768_v26  ;;  %v265_v47 = vsub.f32 %v1443_v57, %v264_v22  ;;  %v278_v50 = vand.u32 4294901760, %v1476_v16 }
  0x35   :  { %977 = vmatprep.subr.mxu1 %v1216_v1  ;;  %953 = vmatpush3.msk.msra.mxu0 %vm63_vm11, %v1218_v13  ;;  %v766_v52 = vsel %vm58_vm0, 1.0, %v1216_v1  ;;  %v259_v54 = vand.u32 4294901760, %v258_v36  ;;  %v1534_v56 = vsub.f32 %v767_v41, %v767_v41  ;;  %v272_v59 = vsub.f32 %v1461_v62, %v271_v37 }
  0x36   :  { %978 = vmatpush3.msra.mxu1 %v238_v14  ;;  %954 = vmatprep.subr.mxu0 %v1216_v1  ;;  %v190_v53 = vand.u32 4294901760, %v1514_v43  ;;  %v285_v60 = vand.u32 4294901760, %v1496_v32  ;;  %v266_v0 = vand.u32 4294901760, %v265_v47  ;;  %v1549_v14 = vsub.f32 %v766_v52, %v766_v52 }
  0x37   :  { %979 = vmatprep.subr.mxu1 %v1216_v1  ;;  %955 = vmatpush3.msk.msra.mxu0 %vm62_vm12, %v1218_v13  ;;  %v279_v15 = vsub.f32 %v1476_v16, %v278_v50  ;;  %v292_v20 = vand.u32 4294901760, %v1517_v45  ;;  %v299_v36 = vand.u32 4294901760, %v1534_v56 }
  0x38   :  { %980 = vmatpush3.msra.mxu1 %v245_v24  ;;  %956 = vmatprep.subr.mxu0 %v1216_v1  ;;  %v191_v61 = vsub.f32 %v1514_v43, %v190_v53  ;;  %v273_v24 = vand.u32 4294901760, %v272_v59  ;;  %v286_v26 = vsub.f32 %v1496_v32, %v285_v60  ;;  %v306_v52 = vand.u32 4294901760, %v1549_v14 }
  0x39   :  { %981 = vmatprep.subr.mxu1 %v1216_v1  ;;  %957 = vmatpush3.msk.msra.mxu0 %vm61_vm13, %v1218_v13  ;;  %v293_v47 = vsub.f32 %v1517_v45, %v292_v20  ;;  %v300_v59 = vsub.f32 %v1534_v56, %v299_v36 }
  0x3a   :  { %982 = vmatpush3.msra.mxu1 %v252_v44  ;;  %958 = vmatprep.subr.mxu0 %v1216_v1  ;;  %v192_v41 = vand.u32 4294901760, %v191_v61  ;;  %v280_v44 = vand.u32 4294901760, %v279_v15 }
  0x3b   :  { %983 = vmatprep.subr.mxu1 %v1216_v1  ;;  %959 = vmatpush3.msk.msra.mxu0 %vm60_vm14, %v1218_v13  ;;  %v294_v61 = vand.u32 4294901760, %v293_v47  ;;  %v301_v15 = vand.u32 4294901760, %v300_v59 }
  0x3c   :  { %984 = vmatpush3.msra.mxu1 %v259_v54  ;;  %960 = vmatprep.subr.mxu0 %v1216_v1  ;;  %v287_v54 = vand.u32 4294901760, %v286_v26 }
  0x3d   :  { %985 = vmatprep.subr.mxu1 %v1216_v1  ;;  %961 = vmatpush3.msk.msra.mxu0 %vm59_vm15, %v1218_v13 }
  0x3e   :  { %986 = vmatpush3.msra.mxu1 %v266_v0  ;;  %962 = vmatprep.subr.mxu0 %v1216_v1  ;;  %v307_v0 = vsub.f32 %v1549_v14, %v306_v52 }
  0x3f   :  { %987 = vmatprep.subr.mxu1 %v1216_v1  ;;  %963 = vmatpush3.msk.msra.mxu0 %vm58_vm0, %v1218_v13 }
  0x40   :  { %988 = vmatpush3.msra.mxu1 %v273_v24  ;;  %1002 = vmatprep.subr.mxu0 %v1216_v1  ;;  %v308_v24 = vand.u32 4294901760, %v307_v0 }
  0x41   :  { %989 = vmatprep.subr.mxu1 %v1216_v1  ;;  %965 = vmatmul.mubr.f32.vlgmr.msra.gmra.mxu0 %v192_v41 }
  0x42   :  { %990 = vmatpush3.msra.mxu1 %v280_v44  ;;  %1003 = vmatpush3.msra.mxu0 %v1330_v23 }
  0x43   :  { %991 = vmatprep.subr.mxu1 %v1216_v1  ;;  %1004 = vmatprep.subr.mxu0 %v1216_v1 }
  0x44   :  { %992 = vmatpush3.msra.mxu1 %v287_v54  ;;  %1005 = vmatpush3.msra.mxu0 %v1305_v17 }
  0x45   :  { %993 = vmatprep.subr.mxu1 %v1216_v1  ;;  %1006 = vmatprep.subr.mxu0 %v1216_v1 }
  0x46   :  { %994 = vmatpush3.msra.mxu1 %v294_v61  ;;  %1007 = vmatpush3.msra.mxu0 %v1307_v18 }
  0x47   :  { %995 = vmatprep.subr.mxu1 %v1216_v1  ;;  %1008 = vmatprep.subr.mxu0 %v1216_v1 }
  0x48   :  { %996 = vmatpush3.msra.mxu1 %v301_v15  ;;  %1009 = vmatpush3.msra.mxu0 %v1309_v19 }
  0x49   :  { %997 = vmatprep.subr.mxu1 %v1216_v1  ;;  %1010 = vmatprep.subr.mxu0 %v1216_v1 }
  0x4a   :  { %998 = vmatpush3.msra.mxu1 %v308_v24  ;;  %1011 = vmatpush3.msra.mxu0 %v1319_v21 }
  0x4b   :  { %1000 = vmatmul.mubr.f32.vlgmr.msra.gmra.mxu1 %v1493_v31  ;;  %1037 = vmatprep.subr.mxu1 %v1216_v1 }
  0x4c   :  { %1012 = vmatprep.subr.mxu0 %v1216_v1  ;;  %1038 = vmatpush3.msk.msra.mxu1 %vm73_vm1, %v1218_v13 }
  0x4d   :  { %1013 = vmatpush3.msra.mxu0 %v1345_v27  ;;  %1039 = vmatprep.subr.mxu1 %v1216_v1 }
  0x4e   :  { %1014 = vmatprep.subr.mxu0 %v1216_v1  ;;  %1040 = vmatpush3.msk.msra.mxu1 %vm72_vm2, %v1218_v13 }
  0x4f   :  { %1015 = vmatpush3.msra.mxu0 %v1367_v34  ;;  %1041 = vmatprep.subr.mxu1 %v1216_v1 }
  0x50   :  { %1016 = vmatprep.subr.mxu0 %v1216_v1  ;;  %1042 = vmatpush3.msk.msra.mxu1 %vm71_vm3, %v1218_v13 }
  0x51   :  { %1017 = vmatpush3.msra.mxu0 %v1389_v40  ;;  %1043 = vmatprep.subr.mxu1 %v1216_v1 }
  0x52   :  { %1018 = vmatprep.subr.mxu0 %v1216_v1  ;;  %1044 = vmatpush3.msk.msra.mxu1 %vm70_vm4, %v1218_v13 }
  0x53   :  { %1019 = vmatpush3.msra.mxu0 %v1420_v51  ;;  %1045 = vmatprep.subr.mxu1 %v1216_v1 }
  0x54   :  { %1020 = vmatprep.subr.mxu0 %v1216_v1  ;;  %1046 = vmatpush3.msk.msra.mxu1 %vm69_vm5, %v1218_v13 }
  0x55   :  { %1021 = vmatpush3.msra.mxu0 %v1443_v57  ;;  %1047 = vmatprep.subr.mxu1 %v1216_v1 }
  0x56   :  { %1022 = vmatprep.subr.mxu0 %v1216_v1  ;;  %1048 = vmatpush3.msk.msra.mxu1 %vm68_vm6, %v1218_v13 }
  0x57   :  { %1023 = vmatpush3.msra.mxu0 %v1461_v62  ;;  %1049 = vmatprep.subr.mxu1 %v1216_v1 }
  0x58   :  { %1024 = vmatprep.subr.mxu0 %v1216_v1  ;;  %1050 = vmatpush3.msk.msra.mxu1 %vm67_vm7, %v1218_v13 }
  0x59   :  { %1025 = vmatpush3.msra.mxu0 %v1476_v16  ;;  %1051 = vmatprep.subr.mxu1 %v1216_v1 }
  0x5a   :  { %1026 = vmatprep.subr.mxu0 %v1216_v1  ;;  %1052 = vmatpush3.msk.msra.mxu1 %vm66_vm8, %v1218_v13 }
  0x5b   :  { %1027 = vmatpush3.msra.mxu0 %v1496_v32  ;;  %1053 = vmatprep.subr.mxu1 %v1216_v1 }
  0x5c   :  { %1028 = vmatprep.subr.mxu0 %v1216_v1  ;;  %1054 = vmatpush3.msk.msra.mxu1 %vm1853_vm9, %v1218_v13  ;;  %vm1854_vm9 = vmmov 0  }
  0x5d   :  { %1029 = vmatpush3.msra.mxu0 %v1517_v45  ;;  %1055 = vmatprep.subr.mxu1 %v1216_v1 }
  0x5e   :  { %1030 = vmatprep.subr.mxu0 %v1216_v1  ;;  %1056 = vmatpush3.msk.msra.mxu1 %vm64_vm10, %v1218_v13 }
  0x5f   :  { %1031 = vmatpush3.msra.mxu0 %v1534_v56  ;;  %1057 = vmatprep.subr.mxu1 %v1216_v1 }
  0x60   :  { %1032 = vmatprep.subr.mxu0 %v1216_v1  ;;  %1058 = vmatpush3.msk.msra.mxu1 %vm63_vm11, %v1218_v13 }
  0x61   :  { %1033 = vmatpush3.msra.mxu0 %v1549_v14  ;;  %1034 = vmatprep.mubr.msk.f32.mxu0 %vm1854_vm9, %v1216_v1 }
  0x62   :  { %1059 = vmatprep.subr.mxu1 %v1216_v1  ;;  %1035 = vmatmul.mubr.f32.vlgmr.msra.gmra.mxu0 %v1514_v43 }
  0x63   :  { %1060 = vmatpush3.msk.msra.mxu1 %vm62_vm12, %v1218_v13  ;;  %1072 = vmatprep.subr.mxu0 %v1216_v1 }
  0x64   :  { %1061 = vmatprep.subr.mxu1 %v1216_v1  ;;  %1073 = vmatpush3.msra.mxu0 %v201_v30 }
  0x65   :  { %1062 = vmatpush3.msk.msra.mxu1 %vm61_vm13, %v1218_v13  ;;  %1074 = vmatprep.subr.mxu0 %v1216_v1 }
  0x66   :  { %1063 = vmatprep.subr.mxu1 %v1216_v1  ;;  %1075 = vmatpush3.msra.mxu0 %v208_v25 }
  0x67   :  { %1064 = vmatpush3.msk.msra.mxu1 %vm60_vm14, %v1218_v13  ;;  %1076 = vmatprep.subr.mxu0 %v1216_v1 }
  0x68   :  { %1065 = vmatprep.subr.mxu1 %v1216_v1  ;;  %1077 = vmatpush3.msra.mxu0 %v215_v28 }
  0x69   :  { %1066 = vmatpush3.msk.msra.mxu1 %vm59_vm15, %v1218_v13  ;;  %1078 = vmatprep.subr.mxu0 %v1216_v1 }
  0x6a   :  { %1067 = vmatprep.subr.mxu1 %v1216_v1  ;;  %1079 = vmatpush3.msra.mxu0 %v222_v33 }
  0x6b   :  { %1068 = vmatpush3.msk.msra.mxu1 %vm58_vm0, %v1218_v13  ;;  %1069 = vmatprep.mubr.msk.f32.mxu1 %vm1854_vm9, %v1216_v1 }
  0x6c   :  { %1080 = vmatprep.subr.mxu0 %v1216_v1  ;;  %1070 = vmatmul.mubr.f32.vlgmr.msra.gmra.mxu1 %v190_v53 }
  0x6d   :  { %1081 = vmatpush3.msra.mxu0 %v229_v38  ;;  %1107 = vmatprep.subr.mxu1 %v1216_v1 }
  0x6e   :  { %1082 = vmatprep.subr.mxu0 %v1216_v1  ;;  %1108 = vmatpush3.msk.msra.mxu1 %vm73_vm1, %v1218_v13  ;;  %vm1855_vm1 = vcmp.eq.s32.totalorder %v1276_v12, %v1264_v8 }
  0x6f   :  { %1083 = vmatpush3.msra.mxu0 %v236_v46  ;;  %1109 = vmatprep.subr.mxu1 %v1216_v1 }
  0x70   :  { %1084 = vmatprep.subr.mxu0 %v1216_v1  ;;  %1110 = vmatpush3.msk.msra.mxu1 %vm72_vm2, %v1218_v13 }
  0x71   :  { %1085 = vmatpush3.msra.mxu0 %v243_v48  ;;  %1111 = vmatprep.subr.mxu1 %v1216_v1 }
  0x72   :  { %1086 = vmatprep.subr.mxu0 %v1216_v1  ;;  %1112 = vmatpush3.msk.msra.mxu1 %vm71_vm3, %v1218_v13 }
  0x73   :  { %1087 = vmatpush3.msra.mxu0 %v250_v58  ;;  %1113 = vmatprep.subr.mxu1 %v1216_v1 }
  0x74   :  { %1088 = vmatprep.subr.mxu0 %v1216_v1  ;;  %1114 = vmatpush3.msk.msra.mxu1 %vm70_vm4, %v1218_v13 }
  0x75   :  { %1089 = vmatpush3.msra.mxu0 %v257_v63  ;;  %1115 = vmatprep.subr.mxu1 %v1216_v1 }
  0x76   :  { %1090 = vmatprep.subr.mxu0 %v1216_v1  ;;  %1116 = vmatpush3.msk.msra.mxu1 %vm69_vm5, %v1218_v13 }
  0x77   :  { %1091 = vmatpush3.msra.mxu0 %v264_v22  ;;  %1117 = vmatprep.subr.mxu1 %v1216_v1 }
  0x78   :  { %1092 = vmatprep.subr.mxu0 %v1216_v1  ;;  %1118 = vmatpush3.msk.msra.mxu1 %vm68_vm6, %v1218_v13 }
  0x79   :  { %1093 = vmatpush3.msra.mxu0 %v271_v37  ;;  %1119 = vmatprep.subr.mxu1 %v1216_v1 }
  0x7a   :  { %1094 = vmatprep.subr.mxu0 %v1216_v1  ;;  %1120 = vmatpush3.msk.msra.mxu1 %vm67_vm7, %v1218_v13 }
  0x7b   :  { %1095 = vmatpush3.msra.mxu0 %v278_v50  ;;  %1121 = vmatprep.subr.mxu1 %v1216_v1 }
  0x7c   :  { %1096 = vmatprep.subr.mxu0 %v1216_v1  ;;  %1122 = vmatpush3.msk.msra.mxu1 %vm66_vm8, %v1218_v13 }
  0x7d   :  { %1097 = vmatpush3.msra.mxu0 %v285_v60  ;;  %1123 = vmatprep.subr.mxu1 %v1216_v1 }
  0x7e   :  { %1098 = vmatprep.subr.mxu0 %v1216_v1  ;;  %1124 = vmatpush3.msk.msra.mxu1 %vm1855_vm1, %v1218_v13 }
  0x7f   :  { %1099 = vmatpush3.msra.mxu0 %v292_v20  ;;  %1125 = vmatprep.subr.mxu1 %v1216_v1 }
  0x80   :  { %1100 = vmatprep.subr.mxu0 %v1216_v1  ;;  %1126 = vmatpush3.msk.msra.mxu1 %vm64_vm10, %v1218_v13 }
  0x81   :  { %1101 = vmatpush3.msra.mxu0 %v299_v36  ;;  %1127 = vmatprep.subr.mxu1 %v1216_v1 }
  0x82   :  { %1102 = vmatprep.subr.mxu0 %v1216_v1  ;;  %1128 = vmatpush3.msk.msra.mxu1 %vm63_vm11, %v1218_v13 }
  0x83   :  { %1103 = vmatpush3.msra.mxu0 %v306_v52  ;;  %1104 = vmatprep.mubr.msk.f32.mxu0 %vm1854_vm9, %v1216_v1 }
  0x84   :  { %1129 = vmatprep.subr.mxu1 %v1216_v1  ;;  %1105 = vmatmul.mubr.f32.vlgmr.msra.gmra.mxu0 %v1493_v31 }
  0x85   :  { %1130 = vmatpush3.msk.msra.mxu1 %vm62_vm12, %v1218_v13  ;;  %1139 = vmatprep.mubr.msk.f32.mxu1 %vm1854_vm9, %v1216_v1 }
  0x86   :  { %1131 = vmatprep.subr.mxu1 %v1216_v1 }
  0x87   :  { %1132 = vmatpush3.msk.msra.mxu1 %vm61_vm13, %v1218_v13 }
  0x88   :  { %1133 = vmatprep.subr.mxu1 %v1216_v1 }
  0x89   :  { %1134 = vmatpush3.msk.msra.mxu1 %vm60_vm14, %v1218_v13 }
  0x8a   :  { %1135 = vmatprep.subr.mxu1 %v1216_v1 }
  0x8b   :  { %1136 = vmatpush3.msk.msra.mxu1 %vm59_vm15, %v1218_v13 }
  0x8c   :  { %1137 = vmatprep.subr.mxu1 %v1216_v1 }
  0x8d   :  { %1138 = vmatpush3.msk.msra.mxu1 %vm58_vm0, %v1218_v13 }
  0x8e   :  { %1140 = vmatmul.mubr.f32.vlgmr.msra.gmra.mxu1 %v1493_v31 }
 0x101   :  { %v194_v3 = vpop.f32.mrf.mxu0 }
 0x103   :  { %v966_v4 = vpop.f32.mrf.mxu0 }
 0x10b   :  { %v345_v5 = vpop.f32.mrf.mxu1 }
 0x10c   :  { %v346_v18 = vadd.f32 %v345_v5, %v194_v3 }
 0x10d   :  { %v1001_v6 = vpop.f32.mrf.mxu1 }
 0x122   :  { %v449_v7 = vpop.f32.mrf.mxu0 }
 0x123   :  { %v450_v19 = vadd.f32 %v449_v7, %v346_v18 }
 0x124   :  { %v1036_v9 = vpop.f32.mrf.mxu0 }
 0x12c   :  { %v538_v10 = vpop.f32.mrf.mxu1 }
 0x12d   :  { %v539_v1 = vadd.f32 %v538_v10, %v450_v19 }
 0x12e   :  { %v1071_v11 = vpop.f32.mrf.mxu1 }
 0x144   :  { %v657_v12 = vpop.f32.mrf.mxu0 }
 0x145   :  { %v658_v21 = vadd.f32 %v657_v12, %v539_v1 }
 0x146   :  { %v1106_v17 = vpop.f32.mrf.mxu0 }
 0x14e   :  { %v744_v2 = vpop.f32.mrf.mxu1 }
 0x14f   :  { %v745_v8 = vadd.f32 %v744_v2, %v658_v21 }
 0x150   :  { %v1141_v13 = vpop.f32.mrf.mxu1 }
 0x151   :  { %748 = vst [vmem:[#allocation7] sm:$0xff] %v745_v8 }
 0x152   :  { %1199 = shalt.err (!%p1196_p0)
}
 0x153   :  { %758 = dma.vmem_to_hbm [thread:$0]  %s756_s1, 128, %s1850_s2, [#allocation4]  }
 0x154   :  { %1212 = dma.done.wait [#allocation4], 128  }
 0x155   :  { %1213 = vsyncadd [#allocation4], 4294967168 }
 0x156   :  { %762 = vsyncpa [#allocation3], 1 }
 0x157   :  { %763 = vsyncpa [#allocation6], 1 }
 0x158   :  { %764 = vsyncpa [#allocation4], 1 }

</bundles_post_ra>
